<compile_context>
chip_gen: v7x
topology: tpu7x:2x2x1
jax: 0.10.0
libtpu: 0.0.40
codegen_flags: <defaults>
</compile_context>

<pallas_src>
import jax
import jax.numpy as jnp
from jax.experimental import pallas as pl
from jax.experimental.pallas import tpu as pltpu


def _round_up(x, m):
    return ((x + m - 1) // m) * m


def _head_kernel(x_ref, w1_ref, b1_ref, w2_ref, b2_ref, o_ref):
    # x_ref : [TM, H]  (caller dtype)   w1_ref: [H, H]  bf16   b1_ref: [1, H]  f32
    # w2_ref: [H, Lp]  bf16             b2_ref: [1, Lp] f32    o_ref : [TM, Lp]
    x = x_ref[...].astype(jnp.bfloat16)                       # in-kernel cast
    # dense: x @ W1 (bf16 MXU, f32 accumulate) + b1, then relu (f32 on VPU)
    h = jnp.dot(x, w1_ref[...], preferred_element_type=jnp.float32)
    h = jnp.maximum(h + b1_ref[...], 0.0)
    # out_proj: relu(h) @ W2 (bf16 MXU, f32 accumulate) + b2
    o = jnp.dot(h.astype(jnp.bfloat16), w2_ref[...],
                preferred_element_type=jnp.float32)
    o_ref[...] = (o + b2_ref[...]).astype(o_ref.dtype)        # lane-dense store


def prepare_gpt2_head_params(w1, b1, w2, b2):
    """One-time (parameter-load-time) prep: bf16 weights, lane-padded labels.

    w1: [H, H] (in, out);  b1: [H];  w2: [H, L] (in, out);  b2: [L].
    Returns (w1_bf16, b1_f32_2d, w2_bf16_padded, b2_f32_2d_padded, num_labels).
    """
    H = w1.shape[0]
    L = w2.shape[1]
    Lp = _round_up(max(L, 128), 128)
    w1_b = w1.astype(jnp.bfloat16)
    w2_p = jnp.zeros((H, Lp), jnp.bfloat16).at[:, :L].set(w2.astype(jnp.bfloat16))
    b1_2d = b1.reshape(1, H).astype(jnp.float32)
    b2_2d = jnp.zeros((1, Lp), jnp.float32).at[:, :L].set(b2.astype(jnp.float32))
    return w1_b, b1_2d, w2_p, b2_2d, L


def gpt2_classification_head_apply(features, w1_b, b1_2d, w2_p, b2_2d, num_labels,
                                   *, tm=512, core_parallel=False):
    """Per-call forward.  `features`: [B, H]; params from prepare_gpt2_head_params."""
    B, H = features.shape
    Lp = w2_p.shape[1]
    L = num_labels

    # Keep caller dtype on the output when bf16 (halves writeback), else f32.
    out_dtype = jnp.bfloat16 if features.dtype == jnp.bfloat16 else jnp.float32

    # Batch tile: big by default (MXU rows / step-overhead amortization),
    # clamped to the sublane-rounded batch so tiny batches use one exact tile.
    sub = 16 if features.dtype == jnp.bfloat16 else 8
    tm = max(min(tm, _round_up(B, sub)), sub)
    grid = (pl.cdiv(B, tm),)

    # Explicit VMEM budget: double-buffered x/out tiles, single-buffered
    # resident weights/biases, plus in-kernel f32/bf16 intermediates.
    in_bytes = jnp.dtype(features.dtype).itemsize
    out_bytes = jnp.dtype(out_dtype).itemsize
    need = (2 * tm * H * in_bytes          # x tiles (double-buffered)
            + H * H * 2 + H * Lp * 2       # W1, W2 (bf16, single-buffered)
            + (H + Lp) * 4                 # biases (f32)
            + 2 * tm * Lp * out_bytes      # out tiles (double-buffered)
            + tm * H * 4 + tm * H * 2      # f32 h + bf16 recast temp
            + tm * Lp * 4)                 # f32 o temp
    vmem_limit = int(min(max(2 * need + (4 << 20), 32 << 20), 64 << 20))

    # On v7x, CORE_PARALLEL shards the batch grid across the 2 TensorCores.
    semantics = (pltpu.CORE_PARALLEL,) if core_parallel else ("parallel",)

    resident = pl.Buffered(1)  # constant index maps -> never re-fetched

    out = pl.pallas_call(
        _head_kernel,
        out_shape=jax.ShapeDtypeStruct((B, Lp), out_dtype),
        grid_spec=pltpu.PrefetchScalarGridSpec(
            num_scalar_prefetch=0,
            grid=grid,
            in_specs=[
                pl.BlockSpec((tm, H), lambda i: (i, 0)),    # activations: tiled over batch
                pl.BlockSpec((H, H), lambda i: (0, 0), pipeline_mode=resident),   # W1
                pl.BlockSpec((1, H), lambda i: (0, 0), pipeline_mode=resident),   # b1
                pl.BlockSpec((H, Lp), lambda i: (0, 0), pipeline_mode=resident),  # W2
                pl.BlockSpec((1, Lp), lambda i: (0, 0), pipeline_mode=resident),  # b2
            ],
            out_specs=pl.BlockSpec((tm, Lp), lambda i: (i, 0)),
        ),
        compiler_params=pltpu.CompilerParams(
            dimension_semantics=semantics,
            vmem_limit_bytes=vmem_limit,
        ),
    )(features, w1_b, b1_2d, w2_p, b2_2d)

    # Strip label-lane padding outside the kernel (batch is exact: out_shape=(B, Lp)).
    return out[:, :L]


def gpt2_classification_head(features, w1, b1, w2, b2, *, tm=512, core_parallel=False):
    """Convenience wrapper. For production, call prepare_gpt2_head_params ONCE
    (parameter-load time) and gpt2_classification_head_apply per step."""
    params = prepare_gpt2_head_params(w1, b1, w2, b2)
    return gpt2_classification_head_apply(features, *params, tm=tm,
                                          core_parallel=core_parallel)


if __name__ == "__main__":
    # Small shapes consistent with the module: batch=8, hidden=128, labels=2.
    B, H, L = 8, 128, 2

    key = jax.random.PRNGKey(0)
    k_x, k_w1, k_b1, k_w2, k_b2 = jax.random.split(key, 5)

    features = jax.random.normal(k_x, (B, H), dtype=jnp.float32)

    # Deterministic init roughly matching nn.Linear's U(-1/sqrt(fan_in), ...)
    # scaling; weights stored already transposed to (in_features, out_features).
    bound1 = 1.0 / (H ** 0.5)
    w1 = jax.random.uniform(k_w1, (H, H), jnp.float32, -bound1, bound1)
    b1 = jax.random.uniform(k_b1, (H,), jnp.float32, -bound1, bound1)
    w2 = jax.random.uniform(k_w2, (H, L), jnp.float32, -bound1, bound1)
    b2 = jax.random.uniform(k_b2, (L,), jnp.float32, -bound1, bound1)

    # One-time parameter prep (bf16 cast + lane padding), then per-call apply.
    prepared = prepare_gpt2_head_params(w1, b1, w2, b2)
    out = gpt2_classification_head_apply(features, *prepared)
    out = jax.block_until_ready(out)
    assert out.shape == (B, L)

    # Reference 1: f32 math on bf16-rounded operands (mirrors the kernel's
    # bf16 MXU operands with f32 accumulation) -> tight tolerance.
    xb = features.astype(jnp.bfloat16).astype(jnp.float32)
    w1b = w1.astype(jnp.bfloat16).astype(jnp.float32)
    w2b = w2.astype(jnp.bfloat16).astype(jnp.float32)
    hb = jnp.maximum(xb @ w1b + b1, 0.0)
    ref_bf16 = hb.astype(jnp.bfloat16).astype(jnp.float32) @ w2b + b2
    assert jnp.allclose(out, ref_bf16, atol=2e-3, rtol=2e-3)

    # Reference 2: full-precision eval-mode forward -> loose tolerance
    # (operands lose mantissa to bf16, accumulation is f32).
    ref_f32 = jnp.maximum(features @ w1 + b1, 0.0) @ w2 + b2
    assert jnp.allclose(out, ref_f32, atol=5e-2, rtol=5e-2)

    print("KERNEL_OK")
</pallas_src>

<mosaic_0001>
module attributes {stable_mosaic.version = 11 : i64} {
  func.func @_head_kernel(%arg0: i32, %arg1: memref<8x128xf32, #tpu.memory_space<vmem>>, %arg2: memref<128x128xbf16, #tpu.memory_space<vmem>>, %arg3: memref<1x128xf32, #tpu.memory_space<vmem>>, %arg4: memref<128x128xbf16, #tpu.memory_space<vmem>>, %arg5: memref<1x128xf32, #tpu.memory_space<vmem>>, %arg6: memref<8x128xf32, #tpu.memory_space<vmem>>) attributes {dimension_semantics = [#tpu.dimension_semantics<parallel>], iteration_bounds = array<i64: 1>, scalar_prefetch = 0 : i64, scratch_operands = 0 : i64, tpu.core_type = #tpu.core_type<tc>, window_params = [{transform_indices = @transform_0, window_bounds = array<i64: 8, 128>}, {pipeline_mode = #tpu.pipeline_mode<synchronous>, transform_indices = @transform_1, window_bounds = array<i64: 128, 128>}, {pipeline_mode = #tpu.pipeline_mode<synchronous>, transform_indices = @transform_2, window_bounds = array<i64: 1, 128>}, {pipeline_mode = #tpu.pipeline_mode<synchronous>, transform_indices = @transform_3, window_bounds = array<i64: 128, 128>}, {pipeline_mode = #tpu.pipeline_mode<synchronous>, transform_indices = @transform_4, window_bounds = array<i64: 1, 128>}, {transform_indices = @transform_5, window_bounds = array<i64: 8, 128>}]} {
    %c0 = arith.constant 0 : index
    %c0_0 = arith.constant 0 : index
    %0 = vector.load %arg1[%c0, %c0_0] : memref<8x128xf32, #tpu.memory_space<vmem>>, vector<8x128xf32>
    %1 = arith.truncf %0 : vector<8x128xf32> to vector<8x128xbf16>
    %c0_1 = arith.constant 0 : index
    %c0_2 = arith.constant 0 : index
    %2 = vector.load %arg2[%c0_1, %c0_2] : memref<128x128xbf16, #tpu.memory_space<vmem>>, vector<128x128xbf16>
    %cst = arith.constant dense<0.000000e+00> : vector<8x128xf32>
    %3 = tpu.matmul %1, %2, %cst {dimension_numbers = #tpu.dot_dimension_numbers<[1], [0], [0], [1], [0, 0, 1, 1], [], []>} : vector<8x128xbf16>, vector<128x128xbf16>, vector<8x128xf32> -> vector<8x128xf32>
    %c0_3 = arith.constant 0 : index
    %c0_4 = arith.constant 0 : index
    %4 = vector.load %arg3[%c0_3, %c0_4] : memref<1x128xf32, #tpu.memory_space<vmem>>, vector<1x128xf32>
    %5 = vector.broadcast %4 : vector<1x128xf32> to vector<8x128xf32>
    %6 = arith.addf %3, %5 : vector<8x128xf32>
    %cst_5 = arith.constant 0.000000e+00 : f32
    %7 = vector.broadcast %cst_5 : f32 to vector<8x128xf32>
    %8 = arith.maximumf %6, %7 : vector<8x128xf32>
    %9 = arith.truncf %8 : vector<8x128xf32> to vector<8x128xbf16>
    %c0_6 = arith.constant 0 : index
    %c0_7 = arith.constant 0 : index
    %10 = vector.load %arg4[%c0_6, %c0_7] : memref<128x128xbf16, #tpu.memory_space<vmem>>, vector<128x128xbf16>
    %cst_8 = arith.constant dense<0.000000e+00> : vector<8x128xf32>
    %11 = tpu.matmul %9, %10, %cst_8 {dimension_numbers = #tpu.dot_dimension_numbers<[1], [0], [0], [1], [0, 0, 1, 1], [], []>} : vector<8x128xbf16>, vector<128x128xbf16>, vector<8x128xf32> -> vector<8x128xf32>
    %c0_9 = arith.constant 0 : index
    %c0_10 = arith.constant 0 : index
    %12 = vector.load %arg5[%c0_9, %c0_10] : memref<1x128xf32, #tpu.memory_space<vmem>>, vector<1x128xf32>
    %13 = vector.broadcast %12 : vector<1x128xf32> to vector<8x128xf32>
    %14 = arith.addf %11, %13 : vector<8x128xf32>
    %c0_11 = arith.constant 0 : index
    %c0_12 = arith.constant 0 : index
    %15 = vector.load %arg6[%c0_11, %c0_12] : memref<8x128xf32, #tpu.memory_space<vmem>>, vector<8x128xf32>
    tpu.vector_store %arg6[%c0_11, %c0_12], %14 {strides = array<i32>} : memref<8x128xf32, #tpu.memory_space<vmem>>, vector<8x128xf32>,
    return
  }
  func.func @transform_0(%arg0: i32) -> (i32, i32) {
    %c0_i32 = arith.constant 0 : i32
    %c0_i32_0 = arith.constant 0 : i32
    return %arg0, %c0_i32 : i32, i32
  }
  func.func @transform_1(%arg0: i32) -> (i32, i32) {
    %c0_i32 = arith.constant 0 : i32
    %c0_i32_0 = arith.constant 0 : i32
    %c0_i32_1 = arith.constant 0 : i32
    return %c0_i32, %c0_i32_0 : i32, i32
  }
  func.func @transform_2(%arg0: i32) -> (i32, i32) {
    %c0_i32 = arith.constant 0 : i32
    %c0_i32_0 = arith.constant 0 : i32
    %c0_i32_1 = arith.constant 0 : i32
    return %c0_i32, %c0_i32_0 : i32, i32
  }
  func.func @transform_3(%arg0: i32) -> (i32, i32) {
    %c0_i32 = arith.constant 0 : i32
    %c0_i32_0 = arith.constant 0 : i32
    %c0_i32_1 = arith.constant 0 : i32
    return %c0_i32, %c0_i32_0 : i32, i32
  }
  func.func @transform_4(%arg0: i32) -> (i32, i32) {
    %c0_i32 = arith.constant 0 : i32
    %c0_i32_0 = arith.constant 0 : i32
    %c0_i32_1 = arith.constant 0 : i32
    return %c0_i32, %c0_i32_0 : i32, i32
  }
  func.func @transform_5(%arg0: i32) -> (i32, i32) {
    %c0_i32 = arith.constant 0 : i32
    %c0_i32_0 = arith.constant 0 : i32
    return %arg0, %c0_i32 : i32, i32
  }
}

</mosaic_0001>

<bundles_post_ra>
// kernel: tpu_custom_call.1
= control target key start
LH: loop header
LB: loop body
LE: loop exit
PB: predicated region body
PF: predicated region fallthrough
CT: control target
= control target key end

     0   :  { %10 = vsyncpa [#allocation3], 0  ;;  %s596_s0 = inlined_call_operand.hbm [shape: f32[8,128], index: 0, kind: input, shape index: {}]   ;;  %s597_s1 = inlined_call_operand.hbm [shape: bf16[128,128], index: 1, kind: input, shape index: {}]   ;;  %s598_s2 = inlined_call_operand.vmem [shape: f32[1,128], index: 2, kind: input, shape index: {}]   ;;  %s599_s3 = inlined_call_operand.hbm [shape: bf16[128,128], index: 3, kind: input, shape index: {}]   ;;  %s600_s4 = inlined_call_operand.vmem [shape: f32[1,128], index: 4, kind: input, shape index: {}]   ;;  %s601_s5 = inlined_call_operand.hbm [shape: f32[8,128], index: 5, kind: output, shape index: {}]  }
   0x1   :  { %11 = vsyncpa [#allocation6], 0 }
   0x2   :  { %12 = vsyncpa [#allocation4], 0  ;;  %s498_s18 = smov [#allocation5]   ;;  %s404_s22 = scalar_lea.hbm %s597_s1, 1024 }
   0x3   :  { %s28_s19 = sshll.u32 %s498_s18, 4  ;;  %p405_p0 = scmp.ne.s32.totalorder %s597_s1, %s404_s22  ;;  %s29_s19 = int_to_ptr.vmem [resolvable:$true] %s28_s19 }
   0x4   :  { %p408_p1 = scmp.lt.u32.totalorder %s404_s22, %s597_s1 }
   0x6   :  { %p410_p2 = pnand %p408_p1, %p405_p0 }
   0x8   :  { %413 = shalt.err (!%p410_p2)
}
   0x9   :  { %s414_s27 = scalar_lea.vmem %s29_s19, 1024  ;;  %p419_p4 = scmp.lt.s32.totalorder %s29_s19, %s29_s19 }
   0xa   :  { %p415_p3 = scmp.ne.s32.totalorder %s29_s19, %s414_s27  ;;  %p420_p5 = scmp.lt.s32.totalorder %s414_s27, %s414_s27 }
   0xc   :  { %p421_p6 = por %p420_p5, %p419_p4 }
   0xe   :  { %p422_p7 = pnand %p421_p6, %p415_p3 }
  0x10   :  { %425 = shalt.err (!%p422_p7)
}
  0x11   :  { %s499_s28 = smov 64   ;;  %s500_s29 = smov 4  }
  0x12   :  { %34 = dma.hbm_to_vmem [thread:$0]  %s597_s1, 1024, %s29_s19, [#allocation6], %s499_s28, %s499_s28, %s500_s29  }
  0x13   :  { %s501_s7 = smov [#allocation2]   ;;  %s502_s9 = smov [#allocation7]  }
  0x14   :  { %s19_s8 = sshll.u32 %s501_s7, 4  ;;  %s42_s10 = sshll.u32 %s502_s9, 4  ;;  %s20_s8 = int_to_ptr.vmem [resolvable:$true] %s19_s8  ;;  %s43_s10 = int_to_ptr.vmem [resolvable:$true] %s42_s10 }
  0x15   :  { %s426_s13 = scalar_lea.hbm %s596_s0, 128 }
  0x16   :  { %p427_p8 = scmp.ne.s32.totalorder %s596_s0, %s426_s13  ;;  %p430_p9 = scmp.lt.u32.totalorder %s426_s13, %s596_s0 }
  0x18   :  { %p432_p10 = pnand %p430_p9, %p427_p8 }
  0x1a   :  { %435 = shalt.err (!%p432_p10)
}
  0x1b   :  { %s436_s1 = scalar_lea.vmem %s20_s8, 128  ;;  %p441_p12 = scmp.lt.s32.totalorder %s20_s8, %s20_s8 }
  0x1c   :  { %p437_p11 = scmp.ne.s32.totalorder %s20_s8, %s436_s1  ;;  %p442_p13 = scmp.lt.s32.totalorder %s436_s1, %s436_s1 }
  0x1e   :  { %p443_p0 = por %p442_p13, %p441_p12 }
  0x20   :  { %p444_p1 = pnand %p443_p0, %p437_p11 }
  0x22   :  { %447 = shalt.err (!%p444_p1)
}
  0x23   :  { %22 = dma.hbm_to_vmem [thread:$0]  %s596_s0, 128, %s20_s8, [#allocation3]  }
  0x24   :  { %s448_s22 = scalar_lea.hbm %s599_s3, 1024 }
  0x25   :  { %p449_p2 = scmp.ne.s32.totalorder %s599_s3, %s448_s22  ;;  %p452_p3 = scmp.lt.u32.totalorder %s448_s22, %s599_s3 }
  0x27   :  { %p454_p4 = pnand %p452_p3, %p449_p2 }
  0x29   :  { %457 = shalt.err (!%p454_p4)
}
  0x2a   :  { %s458_s27 = scalar_lea.vmem %s43_s10, 1024  ;;  %p463_p6 = scmp.lt.s32.totalorder %s43_s10, %s43_s10 }
  0x2b   :  { %p459_p5 = scmp.ne.s32.totalorder %s43_s10, %s458_s27  ;;  %p464_p7 = scmp.lt.s32.totalorder %s458_s27, %s458_s27 }
  0x2d   :  { %p465_p8 = por %p464_p7, %p463_p6 }
  0x2f   :  { %p466_p9 = pnand %p465_p8, %p459_p5 }
  0x31   :  { %469 = shalt.err (!%p466_p9)
}
  0x32   :  { %48 = dma.hbm_to_vmem [thread:$0]  %s599_s3, 1024, %s43_s10, [#allocation6], %s499_s28, %s499_s28, %s500_s29  }
  0x33   :  { %492 = dma.done.wait [#allocation3], 128  }
  0x34   :  { %493 = vsyncadd [#allocation3], 4294967168 }
  0x35   :  { %494 = dma.done.wait [#allocation6], 2048  }
  0x36   :  { %495 = vsyncadd [#allocation6], 4294965248  ;;  %v503_v0 = vmov 0.0   ;;  %vm504_vm0 = vmmov 0   ;;  %v388_v1 = vld [vmem:[#allocation5] sm:$0xff]   ;;  %v389_v2 = vld [vmem:[#allocation5 + $0x8] sm:$0xff]  }
  0x37   :  { %340 = vmatprep.subr.bf16.mxu0 %v503_v0  ;;  %356 = vmatprep.mubr.msk.bf16.mxu0 %vm504_vm0, %v503_v0  ;;  %v390_v3 = vld [vmem:[#allocation5 + $0x10] sm:$0xff]   ;;  %v396_v4 = vld [vmem:[#allocation7] sm:$0xff]   ;;  %v391_v5 = vld [vmem:[#allocation5 + $0x18] sm:$0xff]   ;;  %s505_s7 = smov [#allocation8]  }
  0x38   :  { %360 = vmatprep.subr.bf16.mxu1 %v503_v0  ;;  %376 = vmatprep.mubr.msk.bf16.mxu1 %vm504_vm0, %v503_v0  ;;  %v397_v6 = vld [vmem:[#allocation7 + $0x8] sm:$0xff]   ;;  %v392_v7 = vld [vmem:[#allocation5 + $0x20] sm:$0xff]   ;;  %v398_v8 = vld [vmem:[#allocation7 + $0x10] sm:$0xff]   ;;  %s294_s8 = sshll.u32 %s505_s7, 4  ;;  %s295_s8 = int_to_ptr.vmem [resolvable:$true] %s294_s8 }
  0x39   :  { %341 = vmatpush3.bf16.msra.mxu0 %v388_v1  ;;  %361 = vmatpush3.bf16.msra.mxu1 %v396_v4  ;;  %v393_v9 = vld [vmem:[#allocation5 + $0x28] sm:$0xff]   ;;  %v399_v10 = vld [vmem:[#allocation7 + $0x18] sm:$0xff]   ;;  %v394_v11 = vld [vmem:[#allocation5 + $0x30] sm:$0xff]   ;;  %p475_p11 = scmp.lt.s32.totalorder %s295_s8, %s295_s8 }
  0x3a   :  { %342 = vmatprep.subr.bf16.mxu0 %v503_v0  ;;  %362 = vmatprep.subr.bf16.mxu1 %v503_v0  ;;  %v400_v12 = vld [vmem:[#allocation7 + $0x20] sm:$0xff]   ;;  %v395_v13 = vld [vmem:[#allocation5 + $0x38] sm:$0xff]   ;;  %v401_v15 = vld [vmem:[#allocation7 + $0x28] sm:$0xff]  }
  0x3b   :  { %v61_v14 = vld [vmem:[#allocation2] sm:$0xff]  ;;  %v402_v17 = vld [vmem:[#allocation7 + $0x30] sm:$0xff]  }
  0x3c   :  { %v62_v16 = vpack.c.bf16 %v61_v14, %v61_v14  ;;  %v403_v18 = vld [vmem:[#allocation7 + $0x38] sm:$0xff]  }
  0x3d   :  { %343 = vmatpush3.bf16.msra.mxu0 %v389_v2  ;;  %363 = vmatpush3.bf16.msra.mxu1 %v397_v6  ;;  %v304_v19 = vld [vmem:[%s598_s2] ss:$0 sm:$0xff]  ;;  %s470_s2 = scalar_lea.vmem %s295_s8, 128 }
  0x3e   :  { %344 = vmatprep.subr.bf16.mxu0 %v503_v0  ;;  %364 = vmatprep.subr.bf16.mxu1 %v503_v0  ;;  %v313_v27 = vld [vmem:[%s600_s4] ss:$0 sm:$0xff]  ;;  %p471_p10 = scmp.ne.s32.totalorder %s295_s8, %s470_s2  ;;  %p476_p12 = scmp.lt.s32.totalorder %s470_s2, %s470_s2 }
  0x40   :  { %p477_p13 = por %p476_p12, %p475_p11 }
  0x41   :  { %345 = vmatpush3.bf16.msra.mxu0 %v390_v3  ;;  %365 = vmatpush3.bf16.msra.mxu1 %v398_v8 }
  0x42   :  { %346 = vmatprep.subr.bf16.mxu0 %v503_v0  ;;  %366 = vmatprep.subr.bf16.mxu1 %v503_v0  ;;  %p478_p0 = pnand %p477_p13, %p471_p10 }
  0x45   :  { %347 = vmatpush3.bf16.msra.mxu0 %v391_v5  ;;  %367 = vmatpush3.bf16.msra.mxu1 %v399_v10 }
  0x46   :  { %348 = vmatprep.subr.bf16.mxu0 %v503_v0  ;;  %368 = vmatprep.subr.bf16.mxu1 %v503_v0 }
  0x49   :  { %349 = vmatpush3.bf16.msra.mxu0 %v392_v7  ;;  %369 = vmatpush3.bf16.msra.mxu1 %v400_v12 }
  0x4a   :  { %350 = vmatprep.subr.bf16.mxu0 %v503_v0  ;;  %370 = vmatprep.subr.bf16.mxu1 %v503_v0 }
  0x4d   :  { %351 = vmatpush3.bf16.msra.mxu0 %v393_v9  ;;  %371 = vmatpush3.bf16.msra.mxu1 %v401_v15 }
  0x4e   :  { %352 = vmatprep.subr.bf16.mxu0 %v503_v0  ;;  %372 = vmatprep.subr.bf16.mxu1 %v503_v0 }
  0x51   :  { %353 = vmatpush3.bf16.msra.mxu0 %v394_v11  ;;  %373 = vmatpush3.bf16.msra.mxu1 %v402_v17 }
  0x52   :  { %354 = vmatprep.subr.bf16.mxu0 %v503_v0  ;;  %374 = vmatprep.subr.bf16.mxu1 %v503_v0 }
  0x55   :  { %355 = vmatpush3.bf16.msra.mxu0 %v395_v13  ;;  %375 = vmatpush3.bf16.msra.mxu1 %v403_v18 }
  0x58   :  { %357 = vmatmul.mubr.bf16.vlgmr.msra.gmra.mrb[0].mxu0 %v62_v16 }
 0x12b   :  { %v168_v20 = vpop.f32.mrb[0].mxu0 }
 0x12c   :  { %v169_v21 = vadd.f32 %v304_v19, %v168_v20  ;;  %v358_v22 = vpop.f32.mrb[1].mxu0 }
 0x12d   :  { %v171_v23 = vpop.f32.mrb[2].mxu0 }
 0x12e   :  { %v174_v24 = vmax.f32 %v169_v21, 0.0  ;;  %v359_v25 = vpop.f32.mrb[3].mxu0 }
 0x130   :  { %v175_v26 = vpack.c.bf16 %v174_v24, %v174_v24 }
 0x132   :  { %377 = vmatmul.mubr.bf16.vlgmr.msra.gmra.mrb[0].mxu1 %v175_v26 }
 0x205   :  { %v281_v28 = vpop.f32.mrb[0].mxu1 }
 0x206   :  { %v282_v29 = vadd.f32 %v313_v27, %v281_v28  ;;  %v378_v30 = vpop.f32.mrb[1].mxu1 }
 0x207   :  { %v284_v31 = vpop.f32.mrb[2].mxu1 }
 0x208   :  { %287 = vst [vmem:[#allocation8] sm:$0xff] %v282_v29  ;;  %v379_v32 = vpop.f32.mrb[3].mxu1 }
 0x209   :  { %481 = shalt.err (!%p478_p0)
}
 0x20a   :  { %s482_s4 = scalar_lea.hbm %s601_s5, 128 }
 0x20b   :  { %p483_p1 = scmp.ne.s32.totalorder %s601_s5, %s482_s4  ;;  %p486_p2 = scmp.lt.u32.totalorder %s482_s4, %s601_s5 }
 0x20d   :  { %p488_p3 = pnand %p486_p2, %p483_p1 }
 0x20f   :  { %491 = shalt.err (!%p488_p3)
}
 0x210   :  { %297 = dma.vmem_to_hbm [thread:$0]  %s295_s8, 128, %s601_s5, [#allocation4]  }
 0x211   :  { %496 = dma.done.wait [#allocation4], 128  }
 0x212   :  { %497 = vsyncadd [#allocation4], 4294967168 }
 0x213   :  { %301 = vsyncpa [#allocation3], 1 }
 0x214   :  { %302 = vsyncpa [#allocation6], 1 }
 0x215   :  { %303 = vsyncpa [#allocation4], 1 }

</bundles_post_ra>
